<compile_context>
chip_gen: v6e
topology: v6e:2x2x1
jax: 0.10.0
libtpu: 0.0.40
codegen_flags: <defaults>
</compile_context>

<pallas_src>
import functools

import jax
import jax.numpy as jnp
from jax import lax
from jax.experimental import pallas as pl
from jax.experimental.pallas import tpu as pltpu


def _round_up(x, m):
    return ((x + m - 1) // m) * m


def _make_pow_chain(inv_multipliers):
    """If the inverse multipliers are base * integer-ratios with integer steps,
    return (base, steps) so k-th kernel = base_exp ** ratio_k via repeated
    multiplication.  Otherwise return None (fallback: one exp per kernel)."""
    inv_sorted = sorted(inv_multipliers)
    base = inv_sorted[0]
    if base <= 0.0:
        return None
    ratios = [im / base for im in inv_sorted]
    int_ratios = [int(round(r)) for r in ratios]
    for r, ir in zip(ratios, int_ratios):
        if abs(r - ir) > 1e-9 * max(1.0, abs(r)):
            return None
    if int_ratios[0] != 1 or len(set(int_ratios)) != len(int_ratios):
        return None
    steps = []
    for a, b in zip(int_ratios[:-1], int_ratios[1:]):
        if b % a != 0:
            return None
        s = b // a
        if s < 1 or s > 8:           # keep the multiply chain short
            return None
        steps.append(s)
    return float(base), tuple(steps)


def _mmd_tile_kernel(row_blk_ref, col_blk_ref,      # scalar prefetch (SMEM int32)
                     bw_ref,                         # (1,) f32 SMEM: -1/bandwidth
                     zr_ref, zc_ref,                 # (tile, d_pad) VMEM row/col tiles
                     o_ref,                          # (1, 1) f32 SMEM output
                     acc_ref,                        # (1,) f32 SMEM accumulator
                     *, tile, n_x, n_y, mx_pad, inv_multipliers, pow_chain):
    t = pl.program_id(0)
    nt = pl.num_programs(0)
    i = row_blk_ref[t]                               # row block id
    j = col_blk_ref[t]                               # col block id (j >= i)

    @pl.when(t == 0)
    def _init():
        acc_ref[0] = jnp.float32(0.0)

    zr = zr_ref[...]
    zc = zc_ref[...]

    # Pairwise squared distances for this tile; MXU-fed, no transposed Z copy.
    gram = lax.dot_general(zr, zc, (((1,), (1,)), ((), ())),
                           preferred_element_type=jnp.float32)        # (tile, tile)
    r2 = jnp.sum(zr * zr, axis=1, keepdims=True)                      # (tile, 1)
    c2 = jnp.sum(zc * zc, axis=1, keepdims=True)                      # (tile, 1)
    d2 = jnp.maximum(r2 + c2.T - 2.0 * gram, 0.0)                     # (tile, tile)

    neg_inv_bw = bw_ref[0]                                            # scalar (SMEM)

    if pow_chain is not None:
        # Multipliers form a geometric integer chain: exp(c*r) = exp(c)^r, so a
        # single EUP exp plus a few VPU multiplies produce all kernel terms.
        base_inv, steps = pow_chain
        cur = jnp.exp(d2 * (neg_inv_bw * jnp.float32(base_inv)))
        k = cur
        for s in steps:                      # static python unroll
            nxt = cur
            for _ in range(s - 1):
                nxt = nxt * cur
            cur = nxt
            k = k + cur
    else:
        k = jnp.zeros_like(d2)
        for inv_m in inv_multipliers:        # static python unroll
            k = k + jnp.exp(d2 * (neg_inv_bw * jnp.float32(inv_m)))

    # Signed per-row / per-col MMD weights (mean-embedding form): +1/n_x for X
    # rows, -1/n_y for Y rows, 0 for padded rows.  One weighted reduction
    # replaces the three masked XX / XY / YY reductions and the final scaling.
    gr = lax.broadcasted_iota(jnp.int32, (tile, tile), 0) + i * tile
    gc = lax.broadcasted_iota(jnp.int32, (tile, tile), 1) + j * tile
    wx = jnp.float32(1.0 / n_x)
    wy = jnp.float32(-1.0 / n_y)
    zero = jnp.float32(0.0)
    s_row = jnp.where(gr < n_x, wx,
                      jnp.where((gr >= mx_pad) & (gr < mx_pad + n_y), wy, zero))
    s_col = jnp.where(gc < n_x, wx,
                      jnp.where((gc >= mx_pad) & (gc < mx_pad + n_y), wy, zero))

    # Off-diagonal tiles also stand in for their (symmetric) mirror tile.
    dbl = jnp.where(i == j, jnp.float32(1.0), jnp.float32(2.0))
    acc_ref[0] = acc_ref[0] + dbl * jnp.sum(k * s_row * s_col)

    @pl.when(t == nt - 1)
    def _finalize():
        o_ref[0, 0] = acc_ref[0]             # already fully normalised


def mmd_loss(X, Y, *, n_kernels=5, mul_factor=2.0, bandwidth=None, block_rows=None):
    """Pallas TPU implementation of MMDLoss(RBF(n_kernels, mul_factor, bandwidth))."""
    X = jnp.asarray(X, jnp.float32)
    Y = jnp.asarray(Y, jnp.float32)
    n_x, d = X.shape
    n_y, d_y = Y.shape
    assert d == d_y, "X and Y must have the same feature dim"
    n = n_x + n_y

    # Row tile: multiple of 8 sublanes, capped at 128; feature dim padded to a
    # lane-dense multiple of 128 (zero padding does not change distances).
    if block_rows is None:
        block_rows = min(128, _round_up(max(n_x, n_y, 8), 8))
    tile = _round_up(block_rows, 8)
    d_pad = _round_up(max(d, 128), 128)
    # TODO(synk): for very large feature dims, additionally chunk d_pad over a
    # grid axis and accumulate the Gram tile over feature blocks.

    mx_pad = _round_up(n_x, tile)
    my_pad = _round_up(n_y, tile)
    xp = jnp.pad(X, ((0, mx_pad - n_x), (0, d_pad - d)))
    yp = jnp.pad(Y, ((0, my_pad - n_y), (0, d_pad - d)))
    # Tile-aligned stack: the X/Y boundary lands exactly on a row-block edge.
    zp = jnp.concatenate([xp, yp], axis=0)

    n_blocks = (mx_pad + my_pad) // tile
    # Upper-triangular (j >= i) block pairs; the lower triangle is recovered by
    # symmetry inside the kernel (off-diagonal contributions doubled).
    pairs = [(bi, bj) for bi in range(n_blocks) for bj in range(bi, n_blocks)]
    row_blk = jnp.asarray([p[0] for p in pairs], dtype=jnp.int32)
    col_blk = jnp.asarray([p[1] for p in pairs], dtype=jnp.int32)
    n_tiles = len(pairs)

    # -1/bandwidth as one SMEM scalar.  For bandwidth=None use the exact O(N*d)
    # identity  sum_{i,j}||z_i-z_j||^2 = 2*n*sum||z_i||^2 - 2*||sum z_i||^2, so no
    # extra pairwise pass is needed.
    if bandwidth is None:
        z = jnp.concatenate([X, Y], axis=0)
        sum_sq = jnp.sum(z * z)
        col_sum = jnp.sum(z, axis=0)
        sum_d2 = 2.0 * n * sum_sq - 2.0 * jnp.dot(col_sum, col_sum)
        bw = sum_d2 / jnp.float32(n * n - n)
        neg_inv_bw = (-1.0 / bw).astype(jnp.float32).reshape((1,))
    else:
        neg_inv_bw = jnp.full((1,), -1.0 / float(bandwidth), dtype=jnp.float32)

    # bandwidth_multipliers = mul_factor ** (arange(n_kernels) - n_kernels // 2)
    inv_multipliers = tuple(
        1.0 / (float(mul_factor) ** (k - n_kernels // 2)) for k in range(n_kernels))
    pow_chain = _make_pow_chain(inv_multipliers)

    kernel = functools.partial(
        _mmd_tile_kernel, tile=tile, n_x=n_x, n_y=n_y, mx_pad=mx_pad,
        inv_multipliers=inv_multipliers, pow_chain=pow_chain)

    grid_spec = pltpu.PrefetchScalarGridSpec(
        num_scalar_prefetch=2,
        grid=(n_tiles,),
        in_specs=[
            pl.BlockSpec(memory_space=pltpu.SMEM),                       # -1/bw scalar
            pl.BlockSpec((tile, d_pad), lambda t, rb, cb: (rb[t], 0)),   # row tile
            pl.BlockSpec((tile, d_pad), lambda t, rb, cb: (cb[t], 0)),   # col tile
        ],
        out_specs=pl.BlockSpec((1, 1), lambda t, rb, cb: (0, 0),
                               memory_space=pltpu.SMEM),
        scratch_shapes=[pltpu.SMEM((1,), jnp.float32)],
    )

    out = pl.pallas_call(
        kernel,
        out_shape=jax.ShapeDtypeStruct((1, 1), jnp.float32),
        grid_spec=grid_spec,
        # Scalar accumulation in SMEM scratch requires sequential grid execution.
        compiler_params=pltpu.CompilerParams(
            dimension_semantics=("arbitrary",)),
    )(row_blk, col_blk, neg_inv_bw, zp, zp)
    return out[0, 0]


def _mmd_loss_ref(X, Y, *, n_kernels=5, mul_factor=2.0, bandwidth=None):
    # Pure-JAX reference mirroring the PyTorch module.
    Z = jnp.concatenate([X, Y], axis=0).astype(jnp.float32)
    n = Z.shape[0]
    d2 = jnp.sum((Z[:, None, :] - Z[None, :, :]) ** 2, axis=-1)
    bw = jnp.sum(d2) / (n * n - n) if bandwidth is None else jnp.float32(bandwidth)
    mults = jnp.asarray(
        [float(mul_factor) ** (k - n_kernels // 2) for k in range(n_kernels)],
        jnp.float32)
    K = jnp.sum(jnp.exp(-d2[None, ...] / (bw * mults)[:, None, None]), axis=0)
    n_x = X.shape[0]
    XX = jnp.mean(K[:n_x, :n_x])
    XY = jnp.mean(K[:n_x, n_x:])
    YY = jnp.mean(K[n_x:, n_x:])
    return XX - 2.0 * XY + YY


if __name__ == "__main__":
    key = jax.random.PRNGKey(0)
    k1, k2, k3, k4 = jax.random.split(key, 4)

    # Case 1: small aligned shapes, data-dependent bandwidth, default multipliers
    # (exercises the single-exp power-chain path).
    X1 = jax.random.normal(k1, (8, 32), dtype=jnp.float32)
    Y1 = jax.random.normal(k2, (8, 32), dtype=jnp.float32) + 0.5
    got1 = jax.block_until_ready(mmd_loss(X1, Y1))
    ref1 = jax.block_until_ready(_mmd_loss_ref(X1, Y1))
    assert jnp.allclose(got1, ref1, rtol=1e-4, atol=1e-5), (got1, ref1)

    # Case 2: ragged shapes exercising row/feature padding masks and multiple
    # (off-diagonal, symmetry-doubled) tiles.
    X2 = jax.random.normal(k3, (8, 20), dtype=jnp.float32)
    Y2 = jax.random.normal(k4, (12, 20), dtype=jnp.float32) - 0.25
    got2 = jax.block_until_ready(mmd_loss(X2, Y2))
    ref2 = jax.block_until_ready(_mmd_loss_ref(X2, Y2))
    assert jnp.allclose(got2, ref2, rtol=1e-4, atol=1e-5), (got2, ref2)

    # Case 3: fixed bandwidth (compile-time scalar, same single-pass kernel).
    got3 = jax.block_until_ready(mmd_loss(X1, Y1, bandwidth=2.0))
    ref3 = jax.block_until_ready(_mmd_loss_ref(X1, Y1, bandwidth=2.0))
    assert jnp.allclose(got3, ref3, rtol=1e-4, atol=1e-5), (got3, ref3)

    # Case 4: non power-chain multipliers -> fallback per-kernel exp path.
    got4 = jax.block_until_ready(mmd_loss(X2, Y2, n_kernels=3, mul_factor=1.5))
    ref4 = jax.block_until_ready(_mmd_loss_ref(X2, Y2, n_kernels=3, mul_factor=1.5))
    assert jnp.allclose(got4, ref4, rtol=1e-4, atol=1e-5), (got4, ref4)

    print("KERNEL_OK")
</pallas_src>

<mosaic_0001>
module attributes {stable_mosaic.version = 11 : i64} {
  func.func @_mmd_tile_kernel(%arg0: i32, %arg1: memref<3xi32, #tpu.memory_space<smem>>, %arg2: memref<3xi32, #tpu.memory_space<smem>>, %arg3: memref<1xf32, #tpu.memory_space<smem>>, %arg4: memref<8x128xf32, #tpu.memory_space<vmem>>, %arg5: memref<8x128xf32, #tpu.memory_space<vmem>>, %arg6: memref<1x1xf32, #tpu.memory_space<smem>>, %arg7: memref<1xf32, #tpu.memory_space<smem>>) attributes {dimension_semantics = [#tpu.dimension_semantics<arbitrary>], iteration_bounds = array<i64: 3>, scalar_prefetch = 2 : i64, scratch_operands = 1 : i64, tpu.core_type = #tpu.core_type<tc>, window_params = [{transform_indices = @transform_0, window_bounds = array<i64: 1>}, {transform_indices = @transform_1, window_bounds = array<i64: 8, 128>}, {transform_indices = @transform_2, window_bounds = array<i64: 8, 128>}, {transform_indices = @transform_3, window_bounds = array<i64: 1, 1>}]} {
    %0 = arith.index_cast %arg0 : i32 to index
    %1 = memref.load %arg1[%0] : memref<3xi32, #tpu.memory_space<smem>>
    %2 = arith.index_cast %arg0 : i32 to index
    %3 = memref.load %arg2[%2] : memref<3xi32, #tpu.memory_space<smem>>
    %c0_i32 = arith.constant 0 : i32
    %4 = arith.cmpi eq, %arg0, %c0_i32 : i32
    %5 = arith.extui %4 : i1 to i32
    %c0_i32_0 = arith.constant 0 : i32
    %6 = arith.cmpi ne, %5, %c0_i32_0 : i32
    scf.if %6 {
      %cst_28 = arith.constant 0.000000e+00 : f32
      %c0_29 = arith.constant 0 : index
      %85 = memref.load %arg7[%c0_29] : memref<1xf32, #tpu.memory_space<smem>>
      memref.store %cst_28, %arg7[%c0_29] : memref<1xf32, #tpu.memory_space<smem>>
    } else {
    }
    %c0 = arith.constant 0 : index
    %c0_1 = arith.constant 0 : index
    %7 = vector.load %arg4[%c0, %c0_1] : memref<8x128xf32, #tpu.memory_space<vmem>>, vector<8x128xf32>
    %c0_2 = arith.constant 0 : index
    %c0_3 = arith.constant 0 : index
    %8 = vector.load %arg5[%c0_2, %c0_3] : memref<8x128xf32, #tpu.memory_space<vmem>>, vector<8x128xf32>
    %cst = arith.constant dense<0.000000e+00> : vector<8x8xf32>
    %9 = tpu.matmul %7, %8, %cst {dimension_numbers = #tpu.dot_dimension_numbers<[1], [1], [0], [0], [0, 0, 1, 0], [], []>} : vector<8x128xf32>, vector<8x128xf32>, vector<8x8xf32> -> vector<8x8xf32>
    %10 = arith.mulf %7, %7 : vector<8x128xf32>
    %cst_4 = arith.constant dense<0.000000e+00> : vector<8xf32>
    %11 = vector.multi_reduction <add>, %10, %cst_4 [1] : vector<8x128xf32> to vector<8xf32>
    %12 = vector.shape_cast %11 : vector<8xf32> to vector<8x1xf32>
    %13 = arith.mulf %8, %8 : vector<8x128xf32>
    %cst_5 = arith.constant dense<0.000000e+00> : vector<8xf32>
    %14 = vector.multi_reduction <add>, %13, %cst_5 [1] : vector<8x128xf32> to vector<8xf32>
    %15 = vector.shape_cast %14 : vector<8xf32> to vector<8x1xf32>
    %16 = tpu.transpose %15, [1, 0] : vector<8x1xf32> -> vector<1x8xf32>
    %17 = vector.broadcast %12 : vector<8x1xf32> to vector<8x8xf32>
    %18 = vector.broadcast %16 : vector<1x8xf32> to vector<8x8xf32>
    %19 = arith.addf %17, %18 : vector<8x8xf32>
    %cst_6 = arith.constant 2.000000e+00 : f32
    %20 = vector.broadcast %cst_6 : f32 to vector<8x8xf32>
    %21 = arith.mulf %20, %9 : vector<8x8xf32>
    %22 = arith.subf %19, %21 : vector<8x8xf32>
    %cst_7 = arith.constant 0.000000e+00 : f32
    %23 = vector.broadcast %cst_7 : f32 to vector<8x8xf32>
    %24 = arith.maximumf %22, %23 : vector<8x8xf32>
    %c0_8 = arith.constant 0 : index
    %25 = memref.load %arg3[%c0_8] : memref<1xf32, #tpu.memory_space<smem>>
    %cst_9 = arith.constant 2.500000e-01 : f32
    %26 = arith.mulf %25, %cst_9 : f32
    %27 = vector.broadcast %26 : f32 to vector<8x8xf32>
    %28 = arith.mulf %24, %27 : vector<8x8xf32>
    %29 = math.exp %28 : vector<8x8xf32>
    %30 = arith.mulf %29, %29 : vector<8x8xf32>
    %31 = arith.addf %29, %30 : vector<8x8xf32>
    %32 = arith.mulf %30, %30 : vector<8x8xf32>
    %33 = arith.addf %31, %32 : vector<8x8xf32>
    %34 = arith.mulf %32, %32 : vector<8x8xf32>
    %35 = arith.addf %33, %34 : vector<8x8xf32>
    %36 = arith.mulf %34, %34 : vector<8x8xf32>
    %37 = arith.addf %35, %36 : vector<8x8xf32>
    %38 = tpu.iota {dimensions = array<i32: 0>} : vector<8x8xi32>
    %c8_i32 = arith.constant 8 : i32
    %39 = arith.muli %1, %c8_i32 : i32
    %40 = vector.broadcast %39 : i32 to vector<8x8xi32>
    %41 = arith.addi %38, %40 : vector<8x8xi32>
    %42 = tpu.iota {dimensions = array<i32: 1>} : vector<8x8xi32>
    %c8_i32_10 = arith.constant 8 : i32
    %43 = arith.muli %3, %c8_i32_10 : i32
    %44 = vector.broadcast %43 : i32 to vector<8x8xi32>
    %45 = arith.addi %42, %44 : vector<8x8xi32>
    %c8_i32_11 = arith.constant 8 : i32
    %46 = vector.broadcast %c8_i32_11 : i32 to vector<8x8xi32>
    %47 = arith.cmpi slt, %41, %46 : vector<8x8xi32>
    %c8_i32_12 = arith.constant 8 : i32
    %48 = vector.broadcast %c8_i32_12 : i32 to vector<8x8xi32>
    %49 = arith.cmpi sge, %41, %48 : vector<8x8xi32>
    %c16_i32 = arith.constant 16 : i32
    %50 = vector.broadcast %c16_i32 : i32 to vector<8x8xi32>
    %51 = arith.cmpi slt, %41, %50 : vector<8x8xi32>
    %52 = arith.andi %49, %51 : vector<8x8xi1>
    %cst_13 = arith.constant -1.250000e-01 : f32
    %cst_14 = arith.constant 0.000000e+00 : f32
    %53 = vector.broadcast %cst_13 : f32 to vector<8x8xf32>
    %54 = vector.broadcast %cst_14 : f32 to vector<8x8xf32>
    %55 = arith.select %52, %53, %54 : vector<8x8xi1>, vector<8x8xf32>
    %cst_15 = arith.constant 1.250000e-01 : f32
    %56 = vector.broadcast %cst_15 : f32 to vector<8x8xf32>
    %57 = arith.select %47, %56, %55 : vector<8x8xi1>, vector<8x8xf32>
    %c8_i32_16 = arith.constant 8 : i32
    %58 = vector.broadcast %c8_i32_16 : i32 to vector<8x8xi32>
    %59 = arith.cmpi slt, %45, %58 : vector<8x8xi32>
    %c8_i32_17 = arith.constant 8 : i32
    %60 = vector.broadcast %c8_i32_17 : i32 to vector<8x8xi32>
    %61 = arith.cmpi sge, %45, %60 : vector<8x8xi32>
    %c16_i32_18 = arith.constant 16 : i32
    %62 = vector.broadcast %c16_i32_18 : i32 to vector<8x8xi32>
    %63 = arith.cmpi slt, %45, %62 : vector<8x8xi32>
    %64 = arith.andi %61, %63 : vector<8x8xi1>
    %cst_19 = arith.constant -1.250000e-01 : f32
    %cst_20 = arith.constant 0.000000e+00 : f32
    %65 = vector.broadcast %cst_19 : f32 to vector<8x8xf32>
    %66 = vector.broadcast %cst_20 : f32 to vector<8x8xf32>
    %67 = arith.select %64, %65, %66 : vector<8x8xi1>, vector<8x8xf32>
    %cst_21 = arith.constant 1.250000e-01 : f32
    %68 = vector.broadcast %cst_21 : f32 to vector<8x8xf32>
    %69 = arith.select %59, %68, %67 : vector<8x8xi1>, vector<8x8xf32>
    %70 = arith.cmpi eq, %1, %3 : i32
    %cst_22 = arith.constant 1.000000e+00 : f32
    %cst_23 = arith.constant 2.000000e+00 : f32
    %71 = arith.select %70, %cst_22, %cst_23 : f32
    %c0_24 = arith.constant 0 : index
    %72 = memref.load %arg7[%c0_24] : memref<1xf32, #tpu.memory_space<smem>>
    %73 = arith.mulf %37, %57 : vector<8x8xf32>
    %74 = arith.mulf %73, %69 : vector<8x8xf32>
    %75 = vector.shape_cast %74 : vector<8x8xf32> to vector<1x8x8xf32>
    %cst_25 = arith.constant dense<0.000000e+00> : vector<1xf32>
    %76 = vector.multi_reduction <add>, %75, %cst_25 [1, 2] : vector<1x8x8xf32> to vector<1xf32>
    %77 = vector.shape_cast %76 : vector<1xf32> to vector<1x1x1xf32>
    %78 = vector.extract %77[0, 0, 0] : f32 from vector<1x1x1xf32>
    %79 = arith.mulf %71, %78 : f32
    %80 = arith.addf %72, %79 : f32
    %c0_26 = arith.constant 0 : index
    %81 = memref.load %arg7[%c0_26] : memref<1xf32, #tpu.memory_space<smem>>
    memref.store %80, %arg7[%c0_26] : memref<1xf32, #tpu.memory_space<smem>>
    %c2_i32 = arith.constant 2 : i32
    %82 = arith.cmpi eq, %arg0, %c2_i32 : i32
    %83 = arith.extui %82 : i1 to i32
    %c0_i32_27 = arith.constant 0 : i32
    %84 = arith.cmpi ne, %83, %c0_i32_27 : i32
    scf.if %84 {
      %c0_28 = arith.constant 0 : index
      %85 = memref.load %arg7[%c0_28] : memref<1xf32, #tpu.memory_space<smem>>
      %c0_29 = arith.constant 0 : index
      %c0_30 = arith.constant 0 : index
      %86 = memref.load %arg6[%c0_29, %c0_30] : memref<1x1xf32, #tpu.memory_space<smem>>
      memref.store %85, %arg6[%c0_29, %c0_30] : memref<1x1xf32, #tpu.memory_space<smem>>
    } else {
    }
    return
  }
  func.func @transform_0(%arg0: i32, %arg1: memref<3xi32, #tpu.memory_space<smem>>, %arg2: memref<3xi32, #tpu.memory_space<smem>>) -> i32 {
    %c0_i32 = arith.constant 0 : i32
    %c0_i32_0 = arith.constant 0 : i32
    return %c0_i32 : i32
  }
  func.func @transform_1(%arg0: i32, %arg1: memref<3xi32, #tpu.memory_space<smem>>, %arg2: memref<3xi32, #tpu.memory_space<smem>>) -> (i32, i32) {
    %0 = arith.index_cast %arg0 : i32 to index
    %1 = memref.load %arg1[%0] : memref<3xi32, #tpu.memory_space<smem>>
    %c0_i32 = arith.constant 0 : i32
    %c0_i32_0 = arith.constant 0 : i32
    return %1, %c0_i32 : i32, i32
  }
  func.func @transform_2(%arg0: i32, %arg1: memref<3xi32, #tpu.memory_space<smem>>, %arg2: memref<3xi32, #tpu.memory_space<smem>>) -> (i32, i32) {
    %0 = arith.index_cast %arg0 : i32 to index
    %1 = memref.load %arg2[%0] : memref<3xi32, #tpu.memory_space<smem>>
    %c0_i32 = arith.constant 0 : i32
    %c0_i32_0 = arith.constant 0 : i32
    return %1, %c0_i32 : i32, i32
  }
  func.func @transform_3(%arg0: i32, %arg1: memref<3xi32, #tpu.memory_space<smem>>, %arg2: memref<3xi32, #tpu.memory_space<smem>>) -> (i32, i32) {
    %c0_i32 = arith.constant 0 : i32
    %c0_i32_0 = arith.constant 0 : i32
    %c0_i32_1 = arith.constant 0 : i32
    return %c0_i32, %c0_i32_0 : i32, i32
  }
}

</mosaic_0001>

<bundles_post_ra>
// kernel: tpu_custom_call.1
= control target key start
LH: loop header
LB: loop body
LE: loop exit
PB: predicated region body
PF: predicated region fallthrough
CT: control target
= control target key end

     0   :  { %s1041_s0 = inlined_call_operand.vmem [shape: s32[3], index: 0, kind: input, shape index: {}]   ;;  %s1042_s3 = inlined_call_operand.hbm [shape: f32[16,128], index: 3, kind: input, shape index: {}]   ;;  %s1043_s4 = inlined_call_operand.hbm [shape: f32[16,128], index: 4, kind: input, shape index: {}]   ;;  %s1044_s5 = inlined_call_operand.hbm [shape: f32[1,1], index: 5, kind: output, shape index: {}]   ;;  %s1045_s1 = inlined_call_operand.vmem [shape: s32[3], index: 1, kind: input, shape index: {}]   ;;  %s1046_s2 = inlined_call_operand.<no memory space> [shape: f32[1], index: 2, kind: input, shape index: {}]  }
   0x1   :  { %s10_s20 = sshll.u32 %s1041_s0, 4  ;;  %s14_s23 = sshll.u32 %s1045_s1, 4  ;;  %s11_s20 = int_to_ptr.vmem [resolvable:$true] %s10_s20  ;;  %s15_s23 = int_to_ptr.vmem [resolvable:$true] %s14_s23 }
   0x2   :  { %s623_s24 = scalar_lea.vmem %s11_s20, 16  ;;  %p628_p1 = scmp.lt.s32.totalorder %s11_s20, %s11_s20 }
   0x3   :  { %p624_p0 = scmp.ne.s32.totalorder %s11_s20, %s623_s24  ;;  %p629_p2 = scmp.lt.s32.totalorder %s623_s24, %s623_s24 }
   0x5   :  { %p630_p3 = por %p629_p2, %p628_p1 }
   0x7   :  { %p631_p4 = pnand %p630_p3, %p624_p0 }
   0x9   :  { %634 = shalt.err (!%p631_p4)  }
   0xa   :  { %s783_s25 = smov [#allocation4]   ;;  %s635_s26 = scalar_lea.vmem %s15_s23, 16 }
   0xb   :  { %13 = dma.vmem_to_smem %s11_s20, 16, %s783_s25, [#allocation3] }
   0xc   :  { %p636_p5 = scmp.ne.s32.totalorder %s15_s23, %s635_s26  ;;  %p640_p6 = scmp.lt.s32.totalorder %s15_s23, %s15_s23 }
   0xd   :  { %p641_p7 = scmp.lt.s32.totalorder %s635_s26, %s635_s26 }
   0xf   :  { %p642_p8 = por %p641_p7, %p640_p6 }
  0x11   :  { %p643_p9 = pnand %p642_p8, %p636_p5 }
  0x13   :  { %646 = shalt.err (!%p643_p9)  }
  0x14   :  { %s784_s0 = smov [#allocation5]   ;;  %18 = sst [smem:[#allocation6]] %s1046_s2 }
  0x15   :  { %17 = dma.vmem_to_smem %s15_s23, 16, %s784_s0, [#allocation3] }
  0x16   :  { %741 = dma.done.wait [#allocation3], 32 }
  0x17   :  { %742 = vsyncadd [#allocation3], 4294967264 }
  0x18   :  { %20 = sfence }
  0x19   :  { %21 = vsyncpa [#allocation8], 0 }
  0x1a   :  { %23 = vsyncpa [#allocation8 + $0x1], 0 }
  0x1b   :  { %24 = vsyncpa [#allocation11], 0 }
  0x1c   :  { %26 = vsyncpa [#allocation11 + $0x1], 0 }
  0x1d   :  { %27 = vsyncpa [#allocation9], 0  ;;  %s830_s28 = smov 0   ;;  %s832_s29 = smov 0  }
  0x1e   :  { %s834_s30 = smov 0   ;;  %s836_s6 = smov 0  }
  0x1f   :  { %s838_s7 = smov 0   ;;  %s840_s8 = smov 0  }
  0x20   :  { %s842_s2 = smov 0  }
  0x21 LB: > { %s864_s9 = sadd.s32 4294967295, %s781_s2   ;;  %s867_s10 = sadd.s32 1, %s781_s2   ;;  %s781_s2 = sphi %s842_s2, %s1073_s2   ;;  %s777_s8 = sphi %s840_s8, %s1072_s8   ;;  %s773_s7 = sphi %s838_s7, %s1071_s7   ;;  %s769_s6 = sphi %s836_s6, %s1070_s6   ;;  %s765_s30 = sphi %s834_s30, %s1069_s30   ;;  %s761_s29 = sphi %s832_s29, %s1068_s29   ;;  %s757_s28 = sphi %s830_s28, %s1067_s28  }
  0x22   : > { %s58_s11 = sld [smem:[#allocation4 + %s781_s2]]  ;;  %s63_s12 = sadd.s32 1, %s777_s8 }
  0x23   : > { %s59_s13 = sld [smem:[#allocation4 + %s867_s10]]  ;;  %p70_p10 = scmp.ne.s32.totalorder %s777_s8, %s773_s7 }
  0x24   : > { %p1048_p11 = scmp.eq.s32.totalorder %s781_s2, 0  ;;  %p76_p12 = scmp.ne.s32.totalorder %s773_s7, %s769_s6 }
  0x25   : > { %p1049_p13 = scmp.eq.s32.totalorder %s864_s9, 0  ;;  %p1047_p1 = scmp.lt.s32.totalorder %s781_s2, 3 }
  0x26   : > { %p879_p0 = por %p1048_p11, %p70_p10  ;;  %s152_s16 = sand.u32 1, %s777_s8  }
  0x27   : > { %p886_p2 = por %p1049_p13, %p76_p12  ;;  %s503_s17 = sshll.u32 %s152_s16, 3 }
  0x28   : > { %s156_s19 = scalar_lea.vmem [#allocation7], %s503_s17  ;;  %p909_p4 = pnand %p1047_p1, %p879_p0 }
  0x29   : > { %s1053_s15 = scalar_select %p886_p2, 1, 0 }
  0x2a   : > { %s60_s18 = ssub.s32 %s58_s11, %s59_s13  ;;  %s164_s20 = sshll.u32 %s156_s19, 4  ;;  %s903_s20 = int_to_ptr.vmem [resolvable:$true] %s164_s20 }
  0x2b   : > { %p61_p3 = scmp.eq.s32.totalorder %s60_s18, 0  ;;  %p507_p5 = scmp.ge.s32.totalorder %s781_s2, 1 }
  0x2c   : > { %s527_s21 = scalar_select %p879_p0, [#allocation4], [#allocation13] }
  0x2d   : > { %s894_s22 = scalar_select %p61_p3, %s777_s8, %s63_s12  }
  0x2e   : > { %s528_s23 = scalar_select %p879_p0, %s781_s2, 0 }
  0x2f   : > { %s1075_s21 = smov (!%p1047_p1, %s527_s21), [#allocation15]  ;;  %p188_p6 = scmp.lt.s32.totalorder %s781_s2, 4 }
  0x30   : > { %s1077_s23 = smov (!%p1047_p1, %s528_s23), 0  ;;  %s920_s0 = sld [smem:[#allocation5 + %s781_s2]] }
  0x31   : > { %s157_s25 = sld [smem:[%s1075_s21 + %s1077_s23]]  ;;  %p915_p7 = pnand %p507_p5, %p188_p6 }
  0x32   : > { %s923_s27 = sld [smem:[#allocation5 + %s867_s10]]  ;;  %s153_s13 = scalar_lea.sflag [#allocation8], %s152_s16 }
  0x33   : > { %s1055_s26 = scalar_select %p915_p7, 1, 0 }
  0x34   : > { %p649_p9 = pneg %p909_p4  ;;  %s652_s19 = scalar_lea.hbm %s1042_s3, 256 }
  0x37   : > { %s504_s1 = sshll.u32 %s157_s25, 7 }
  0x38   : > { %s162_s12 = scalar_lea.hbm %s1042_s3, %s504_s1 }
  0x39   : > { %s647_s14 = scalar_lea.hbm %s162_s12, 128  ;;  %p653_p0 = scmp.lt.s32.totalorder %s162_s12, %s1042_s3 }
  0x3a   : > { %p648_p8 = scmp.ne.s32.totalorder %s162_s12, %s647_s14  ;;  %p654_p3 = scmp.lt.s32.totalorder %s652_s19, %s647_s14 }
  0x3c   : > { %p650_p10 = pnand %p649_p9, %p648_p8  ;;  %p655_p5 = por %p654_p3, %p653_p0 }
  0x3e   : > { %p651_p12 = pneg %p650_p10 }
  0x40   : > { %p656_p6 = pnand %p655_p5, %p651_p12 }
  0x42   : > { %659 = shalt.err (!%p656_p6)
}
  0x43   : > { %s660_s16 = scalar_lea.vmem %s903_s20, 128  ;;  %s785_s25 = smov [#allocation7]  }
  0x44   : > { %p661_p1 = scmp.ne.s32.totalorder %s903_s20, %s660_s16  ;;  %s665_s1 = sshll.u32 %s785_s25, 4  ;;  %s666_s1 = int_to_ptr.vmem [resolvable:$false] %s665_s1 }
  0x45   : > { %s667_s6 = scalar_lea.vmem %s666_s1, 256  ;;  %p668_p10 = scmp.lt.s32.totalorder %s903_s20, %s666_s1 }
  0x46   : > { %p663_p11 = pnand %p661_p1, %p649_p9  ;;  %p669_p13 = scmp.lt.s32.totalorder %s667_s6, %s660_s16 }
  0x48   : > { %p664_p8 = pneg %p663_p11  ;;  %p670_p2 = por %p669_p13, %p668_p10 }
  0x4a   : > { %p671_p7 = pnand %p670_p2, %p664_p8 }
  0x4c   : > { %674 = shalt.err (!%p671_p7)
}
  0x4d   : > { %548 = dma.hbm_to_vmem [thread:$0]  (!%p909_p4), %s162_s12, 128, %s903_s20, %s153_s13  }
  0x4e   : > { %p98_p11 = scmp.ne.s32.totalorder %s765_s30, %s761_s29  ;;  %p104_p13 = scmp.ne.s32.totalorder %s761_s29, %s757_s28 }
  0x4f   : > { %s91_s24 = sadd.s32 1, %s765_s30  ;;  %p1056_p1 = scmp.eq.s32.totalorder %s864_s9, 0 }
  0x50   : > { %s171_s14 = sand.u32 1, %s765_s30   ;;  %s88_s17 = ssub.s32 %s920_s0, %s923_s27 }
  0x51   : > { %p949_p2 = por %p104_p13, %p1056_p1  ;;  %p1058_p7 = scmp.eq.s32.totalorder %s781_s2, 0 }
  0x52   : > { %p89_p12 = scmp.eq.s32.totalorder %s88_s17, 0  ;;  %s505_s18 = sshll.u32 %s171_s14, 3 }
  0x53   : > { %s1057_s11 = scalar_select %p949_p2, 1, 0 }
  0x54   : > { %p100_p9 = por %p98_p11, %p1058_p7  ;;  %p1059_p0 = scmp.lt.s32.totalorder %s781_s2, 3 }
  0x55   : > { %s965_s20 = scalar_select %p89_p12, %s765_s30, %s91_s24  }
  0x56   : > { %p960_p3 = pnand %p1059_p0, %p100_p9  ;;  %p1061_p4 = pmov %p1059_p0 }
  0x57   : > { %s530_s28 = scalar_select %p100_p9, [#allocation5], [#allocation14] }
  0x58   : > { %s531_s12 = scalar_select %p100_p9, %s781_s2, 0 }
  0x59   : > { %s1079_s28 = smov (!%p1061_p4, %s530_s28), [#allocation16]  ;;  %p1062_p5 = pmov %p1059_p0 }
  0x5a   : > { %s175_s0 = scalar_lea.vmem [#allocation10], %s505_s18  ;;  %s172_s1 = scalar_lea.sflag [#allocation11], %s171_s14 }
  0x5b   : > { %s1081_s12 = smov (!%p1062_p5, %s531_s12), 0  ;;  %s183_s27 = sshll.u32 %s175_s0, 4  ;;  %s972_s27 = int_to_ptr.vmem [resolvable:$true] %s183_s27 }
  0x5c   : > { %s176_s13 = sld [smem:[%s1079_s28 + %s1081_s12]]  ;;  %p677_p8 = pneg %p960_p3 }
  0x5d   : > { %s680_s17 = scalar_lea.hbm %s1043_s4, 256 }
  0x62   : > { %s506_s21 = sshll.u32 %s176_s13, 7 }
  0x63   : > { %s181_s25 = scalar_lea.hbm %s1043_s4, %s506_s21 }
  0x64   : > { %s675_s6 = scalar_lea.hbm %s181_s25, 128  ;;  %p681_p13 = scmp.lt.s32.totalorder %s181_s25, %s1043_s4 }
  0x65   : > { %p676_p6 = scmp.ne.s32.totalorder %s181_s25, %s675_s6  ;;  %p682_p1 = scmp.lt.s32.totalorder %s680_s17, %s675_s6 }
  0x67   : > { %p678_p10 = pnand %p677_p8, %p676_p6  ;;  %p683_p7 = por %p682_p1, %p681_p13 }
  0x69   : > { %p679_p11 = pneg %p678_p10 }
  0x6b   : > { %p684_p9 = pnand %p683_p7, %p679_p11 }
  0x6d   : > { %687 = shalt.err (!%p684_p9)
}
  0x6e   : > { %s688_s14 = scalar_lea.vmem %s972_s27, 128  ;;  %s786_s12 = smov [#allocation10]  }
  0x6f   : > { %p689_p12 = scmp.ne.s32.totalorder %s972_s27, %s688_s14  ;;  %s693_s13 = sshll.u32 %s786_s12, 4  ;;  %s694_s13 = int_to_ptr.vmem [resolvable:$false] %s693_s13 }
  0x70   : > { %s695_s0 = scalar_lea.vmem %s694_s13, 256  ;;  %p696_p5 = scmp.lt.s32.totalorder %s972_s27, %s694_s13 }
  0x71   : > { %p691_p0 = pnand %p689_p12, %p677_p8  ;;  %p697_p6 = scmp.lt.s32.totalorder %s695_s0, %s688_s14 }
  0x73   : > { %p692_p4 = pneg %p691_p0  ;;  %p698_p10 = por %p697_p6, %p696_p5 }
  0x75   : > { %p699_p2 = pnand %p698_p10, %p692_p4 }
  0x77   : > { %702 = shalt.err (!%p699_p2)
}
  0x78   : > { %553 = dma.hbm_to_vmem [thread:$0]  (!%p960_p3), %s181_s25, 128, %s972_s27, %s172_s1  }
  0x79   : > { %p1063_p11 = scmp.ne.s32.totalorder %s1055_s26, 0 }
  0x7a   : > { %s194_s21 = sand.u32 (!%p1063_p11), 1, %s773_s7   ;;  %p1064_p8 = scmp.ne.s32.totalorder (!%p1063_p11), %s1053_s15, 0 }
  0x7b   : > { %192 = sbr.rel (%p1063_p11) target bundleno = 650 (0x28a), region = 32  ;;  %s508_s23 = sshll.u32 (!%p1063_p11), %s194_s21, 3 }
  0x7c   : > { %s195_s16 = scalar_lea.sflag (!%p1063_p11), [#allocation8], %s194_s21  ;;  %s198_s6 = scalar_lea.vmem (!%p1063_p11), [#allocation7], %s508_s23 }
  0x80   : > { %744 = dma.done.wait (%p1064_p8), %s195_s16, 128  }
  0x81   : > { %746 = vsyncadd (%p1064_p8), %s195_s16, 4294967168  ;;  %s203_s24 = sand.u32 1, %s761_s29   ;;  %p1065_p2 = scmp.ne.s32.totalorder %s1057_s11, 0 }
  0x82   : > { %s509_s19 = sshll.u32 %s203_s24, 3  ;;  %s204_s2 = scalar_lea.sflag [#allocation11], %s203_s24 }
  0x83   : > { %s207_s27 = scalar_lea.vmem [#allocation10], %s509_s19 }
  0x84   : > { %748 = dma.done.wait (%p1065_p2), %s204_s2, 128  }
  0x85   : > { %750 = vsyncadd (%p1065_p2), %s204_s2, 4294967168  ;;  %v787_v0 = vmov 0.0   ;;  %vm788_vm0 = vmmov 0   ;;  %v241_v1 = vld [vmem:[%s207_s27] sm:$0xff]  ;;  %v240_v3 = vld [vmem:[%s198_s6] sm:$0xff]  ;;  %v350_v8 = vlaneseq  ;;  %s358_s15 = sld [smem:[#allocation6]] }
  0x86   : > { %520 = vmatprep.subr.mxu0 %v787_v0  ;;  %522 = vmatprep.mubr.msk.f32.mxu0 %vm788_vm0, %v787_v0  ;;  %v315_v2 = vmul.f32 %v241_v1, %v241_v1  ;;  %v312_v4 = vmul.f32 %v240_v3, %v240_v3  ;;  %s1004_s11 = sld [smem:[#allocation4 + %s864_s9]]  ;;  %vm399_vm9 = vcmask 64512   ;;  %s789_s18 = smov 0.0  }
  0x87   : > { %521 = vmatpush3.xpose.msra.mxu0 %v241_v1  ;;  %v351_v9 = vshrl.u32 %v350_v8, 7  ;;  %s1007_s25 = sld [smem:[#allocation5 + %s864_s9]]  ;;  %v378_v22 = vand.u32 127, %v350_v8  ;;  %p1066_p3 = scmp.eq.s32.totalorder %s864_s9, 0 }
  0x88   : > { %316 = vadd.xlane.f32.xlu0 %v315_v2  ;;  %p556_p1 = scmp.eq.s32.totalorder %s864_s9, 2  ;;  %s790_s21 = smov [#allocation12]  }
  0x89   : > { %v352_v10 = vsub.s32 0, %v351_v9  ;;  %536 = sst [smem:[#allocation2]] (%p1066_p3), %s789_s18 }
  0x8a   : > { %523 = vmatmul.mubr.f32.vlgmr.msra.gmra.mxu0 %v240_v3  ;;  %s396_s28 = sld [smem:[#allocation2]] }
  0x8b   : > { %s359_s26 = smul.f32 0.25, %s358_s15 }
  0x8c   : > { %313 = vadd.xlane.f32.xlu0 %v312_v4  ;;  %s511_s1 = sshll.u32 %s1004_s11, 3 }
  0x8d   : > { %v360_v17 = vstv %s359_s26  ;;  %s512_s17 = sshll.u32 %s1007_s25, 3  ;;  %v375_v21 = vstv %s511_s1  ;;  %p394_p13 = scmp.eq.s32.totalorder %s1004_s11, %s1007_s25 }
  0x8e   : > { %v380_v23 = vstv %s512_s17  ;;  %v376_v24 = vadd.s32 %v375_v21, %v351_v9 }
  0x8f   : > { %v381_v25 = vadd.s32 %v380_v23, %v378_v22  ;;  %s395_s14 = scalar_select %p394_p13, 1.0, 2.0 }
  0x90   : > { %vm383_vm1 = vcmp.ge.s32.totalorder %v376_v24, 8  ;;  %vm384_vm2 = vcmp.lt.s32.totalorder %v376_v24, 16  ;;  %vm382_vm7 = vcmp.lt.s32.totalorder %v376_v24, 8 }
  0x91   : > { %vm389_vm3 = vcmp.ge.s32.totalorder %v381_v25, 8  ;;  %vm390_vm4 = vcmp.lt.s32.totalorder %v381_v25, 16  ;;  %vm385_vm5 = vmand %vm383_vm1, %vm384_vm2  ;;  %vm388_vm8 = vcmp.lt.s32.totalorder %v381_v25, 8 }
  0x92   : > { %vm391_vm6 = vmand %vm389_vm3, %vm390_vm4  ;;  %v386_v32 = vsel %vm385_vm5, -0.125, %v787_v0 }
  0x93   : > { %v392_v35 = vsel %vm391_vm6, -0.125, %v787_v0  ;;  %v387_v36 = vsel %vm382_vm7, 0.125, %v386_v32 }
  0x94   : > { %v393_v38 = vsel %vm388_vm8, 0.125, %v392_v35 }
 0x111   : > { %v317_v5 = vpop.xlane.xlu0 %316 }
 0x112   : > { %318 = vxpose.xlu1.b32.start.end [1/1] (short) (narrow) %v317_v5, 8 }
 0x115   : > { %v314_v12 = vpop.xlane.xlu0 %313 }
 0x14a   : > { %v308_v6 = vpop.f32.mrf.mxu0 }
 0x14b   : > { %v355_v14 = vmul.f32 2.0, %v308_v6 }
 0x14c   : > { %v524_v7 = vpop.f32.mrf.mxu0 }
 0x18e   : > { %v334_v11 = vpop.trf.xlu1 }
 0x18f   : > { %v353_v13 = vrot.slane %v334_v11, %v352_v10 }
 0x191   : > { %v354_v15 = vadd.f32 %v353_v13, %v314_v12 }
 0x193   : > { %v356_v16 = vsub.f32 %v354_v15, %v355_v14 }
 0x195   : > { %v357_v18 = vmax.f32 %v356_v16, 0.0 }
 0x197   : > { %v361_v19 = vmul.f32 %v360_v17, %v357_v18 }
 0x199   : > { %v362_v20 = vmul.f32 1.442695, %v361_v19 }
 0x19b   : > { %621 = vpow2.f32 %v362_v20 }
 0x1a8   : > { %v622_v26 = vpop.eup %621 }
 0x1a9   : > { %v364_v27 = vmul.f32 %v622_v26, %v622_v26 }
 0x1ab   : > { %v365_v28 = vadd.f32 %v622_v26, %v364_v27  ;;  %v366_v29 = vmul.f32 %v364_v27, %v364_v27 }
 0x1ad   : > { %v367_v30 = vadd.f32 %v366_v29, %v365_v28  ;;  %v368_v31 = vmul.f32 %v366_v29, %v366_v29 }
 0x1af   : > { %v369_v33 = vadd.f32 %v368_v31, %v367_v30  ;;  %v370_v34 = vmul.f32 %v368_v31, %v368_v31 }
 0x1b1   : > { %v371_v37 = vadd.f32 %v370_v34, %v369_v33 }
 0x1b3   : > { %v397_v39 = vmul.f32 %v387_v36, %v371_v37 }
 0x1b5   : > { %v398_v40 = vmul.f32 %v397_v39, %v393_v38 }
 0x1b7   : > { %v400_v41 = vsel %vm399_vm9, %v398_v40, 0.0 }
 0x1b8   : > { %401 = vadd.xlane.f32.xlu1 %v400_v41 }
 0x241   : > { %v402_v42 = vpop.xlane.xlu1 %401 }
 0x242   : > { %v403_v43 = vrot.slane %v402_v42, 4 }
 0x244   : > { %v404_v44 = vadd.f32 %v403_v43, %v402_v42 }
 0x246   : > { %v405_v45 = vrot.slane %v404_v44, 2 }
 0x248   : > { %v406_v46 = vadd.f32 %v405_v45, %v404_v44 }
 0x24a   : > { %v407_v47 = vrot.slane %v406_v46, 1 }
 0x24c   : > { %v408_v48 = vadd.f32 %v407_v47, %v406_v46 }
 0x24e   : > { %525 = vpush %v408_v48 }
 0x27f   : > { %s526_s12 = spop %525 }
 0x280   : > { %s410_s13 = smul.f32 %s526_s12, %s395_s14 }
 0x282   : > { %s411_s0 = sadd.f32 %s410_s13, %s396_s28 }
 0x284   : > { %413 = sst [smem:[#allocation2]] %s411_s0 }
 0x285   : > { %538 = sst [smem:[#allocation12]] (%p556_p1), %s411_s0 }
 0x286   : > { %540 = dma.smem_to_hbm (%p556_p1), %s790_s21, 16, %s1044_s5, [#allocation9]  }
 0x287   : > { %752 = dma.done.wait (%p556_p1), [#allocation9], 16  }
 0x288   : > { %754 = vsyncadd (%p556_p1), [#allocation9], 4294967280 }
 0x289   : > { %434 = sfence }
 0x28a PF: > { %p30_p7 = scmp.ge.s32.totalorder %s867_s10, 5   ;;  %s1067_s28 = smov %s761_s29 }
 0x28b   : > { %s1068_s29 = smov %s765_s30  ;;  %s1069_s30 = smov %s965_s20 }
 0x28c   : > { %s1070_s6 = smov %s773_s7  ;;  %s1071_s7 = smov %s777_s8 }
 0x28d   : > { %s1072_s8 = smov %s894_s22  ;;  %s1073_s2 = smov %s867_s10 }
 0x28e   :  { %32 = sbr.rel (!%p30_p7) target bundleno = 33 (0x21), region = 93 }
 0x293   :  { %440 = vsyncpa [#allocation8], 1 }
 0x294   :  { %442 = vsyncpa [#allocation8 + $0x1], 1 }
 0x295   :  { %443 = vsyncpa [#allocation11], 1 }
 0x296   :  { %445 = vsyncpa [#allocation11 + $0x1], 1 }
 0x297   :  { %446 = vsyncpa [#allocation9], 1 }
 0x298   :  { %448 = vsyncpa [#allocation9 + $0x1], 1 }

</bundles_post_ra>
